<compile_context>
chip_gen: v6e
topology: v6e:2x2x1
jax: 0.10.0
libtpu: 0.0.40
codegen_flags: <defaults>
</compile_context>

<pallas_src>
import jax
import jax.numpy as jnp
from jax.experimental import pallas as pl
from jax.experimental.pallas import tpu as pltpu


def _vq_kernel(x_ref, e_ref, eaug_ref, q_ref, idx_ref, sse_ref, xaug_ref):
    """One (batch, HW-tile) step: distances -> argmin -> quantized cols + SSE."""
    D, TN = x_ref.shape
    K = e_ref.shape[0]

    x_f32 = x_ref[...].astype(jnp.float32)                 # (D, TN)

    # Build x_aug = [x ; 1] in a small VMEM scratch (cheap: D is tiny) so the
    # whole distance dist = ||e||^2 - 2<e,x> runs as a single MXU matmul
    # against the augmented codebook [-2*E | ||E||^2].
    xaug_ref[pl.ds(0, D), :] = x_f32
    xaug_ref[pl.ds(D, 1), :] = jnp.ones((1, TN), jnp.float32)
    x_aug = xaug_ref[...]                                   # (D+1, TN)

    dist = jax.lax.dot_general(
        eaug_ref[...], x_aug, (((1,), (0,)), ((), ())),
        preferred_element_type=jnp.float32)                 # (K, TN)

    # argmin over K (sublane axis) with first-occurrence tie-break
    # (matches torch.argmin).
    min_d = jnp.min(dist, axis=0, keepdims=True)            # (1, TN)
    iota_k = jax.lax.broadcasted_iota(jnp.int32, dist.shape, 0)
    idx = jnp.min(jnp.where(dist == min_d, iota_k, K),
                  axis=0, keepdims=True)                     # (1, TN)

    # Gather codewords via e^T @ onehot (MXU); one-hot built directly in the
    # codebook dtype (no bool -> astype conversion pass).
    e = e_ref[...]                                           # (K, D)
    onehot_T = jnp.where(iota_k == idx,
                         jnp.ones((), e.dtype), jnp.zeros((), e.dtype))
    qT = jax.lax.dot_general(
        e, onehot_T, (((0,), (0,)), ((), ())),
        preferred_element_type=jnp.float32)                  # (D, TN)

    q_ref[...] = qT.astype(q_ref.dtype)
    idx_ref[...] = idx.astype(jnp.int32)

    # Per-column SSE = min_d + ||x||^2 (the dropped argmin-invariant constant);
    # no dependency on the gather matmul, so stores drain in parallel.
    xsq = jnp.sum(x_f32 * x_f32, axis=0, keepdims=True)      # (1, TN)
    sse_ref[...] = min_d + xsq


def vector_quantize(x_nchw, codebook, commitment_cost, *, tile_hw=1024):
    """Forward pass of VectorQuantizer.

    Args:
      x_nchw: (B, C, H, W) activations, C == embedding_dim.
      codebook: (num_embeddings, embedding_dim) embedding weight.
      tile_hw: spatial columns per grid step (multiple of 128; sweepable).
    Returns:
      quantized (B, C, H, W), loss (scalar), indices (B, H, W) int32.
    """
    B, C, H, W = x_nchw.shape
    D = C
    K = codebook.shape[0]
    HW = H * W

    # Free, contiguous reshape (no transpose): D on sublanes, spatial on lanes.
    x = x_nchw.reshape(B, C, HW)

    # Effective tile: multiple of 128, no larger than the padded spatial size.
    hw_pad_min = 128 * pl.cdiv(HW, 128)
    tile = max(128, min(int(tile_hw), hw_pad_min))
    tile = 128 * pl.cdiv(tile, 128)
    num_tiles = pl.cdiv(HW, tile)
    n_pad = num_tiles * tile
    if n_pad != HW:
        x = jnp.pad(x, ((0, 0), (0, 0), (0, n_pad - HW)))

    # Augmented codebook [-2*E | ||E||^2], built once (tiny), f32.
    e_f32 = codebook.astype(jnp.float32)
    e_aug = jnp.concatenate(
        [-2.0 * e_f32, jnp.sum(e_f32 * e_f32, axis=1, keepdims=True)], axis=1)

    grid = (B, num_tiles)
    q, idx, sse_part = pl.pallas_call(
        _vq_kernel,
        out_shape=(
            jax.ShapeDtypeStruct((B, D, n_pad), x_nchw.dtype),
            jax.ShapeDtypeStruct((B, num_tiles, tile), jnp.int32),
            jax.ShapeDtypeStruct((B, num_tiles, tile), jnp.float32),
        ),
        grid_spec=pltpu.PrefetchScalarGridSpec(
            num_scalar_prefetch=0,
            grid=grid,
            in_specs=[
                # Batch dim squeezed out; kernel sees (D, tile).
                pl.BlockSpec((None, D, tile), lambda b, i: (b, 0, i)),
                # Codebook & augmented codebook: constant block index, fetched once.
                pl.BlockSpec((K, D), lambda b, i: (0, 0)),
                pl.BlockSpec((K, D + 1), lambda b, i: (0, 0)),
            ],
            out_specs=(
                pl.BlockSpec((None, D, tile), lambda b, i: (b, 0, i)),
                pl.BlockSpec((None, 1, tile), lambda b, i: (b, i, 0)),
                pl.BlockSpec((None, 1, tile), lambda b, i: (b, i, 0)),
            ),
            scratch_shapes=[pltpu.VMEM((D + 1, tile), jnp.float32)],
        ),
        compiler_params=pltpu.CompilerParams(
            dimension_semantics=("parallel", "parallel"),
            # (K, tile) f32 intermediates are well under 32 MiB for these K;
            # re-derive tile_hw / add K-chunking for huge codebooks on v7x.
            vmem_limit_bytes=32 * 1024 * 1024,
        ),
    )(x, codebook, e_aug)

    # commitment_loss + embedding_loss == (1 + commitment_cost) * MSE(q, x).
    # Padded columns sit at the end of each image's flattened axis -> slice
    # per image before reducing.
    sse_total = jnp.sum(sse_part.reshape(B, n_pad)[:, :HW])
    mse = sse_total / jnp.float32(B * HW * D)
    loss = (1.0 + commitment_cost) * mse

    quantized = q[:, :, :HW].reshape(B, C, H, W)
    indices = idx.reshape(B, n_pad)[:, :HW].reshape(B, H, W)
    return quantized, loss, indices


def _reference(x_nchw, codebook, commitment_cost):
    """Plain-JAX reference mirroring the PyTorch forward exactly."""
    B, C, H, W = x_nchw.shape
    flat = jnp.transpose(x_nchw, (0, 2, 3, 1)).reshape(-1, C)
    dist = (jnp.sum(flat ** 2, axis=1, keepdims=True)
            - 2.0 * flat @ codebook.T
            + jnp.sum(codebook ** 2, axis=1))
    idx = jnp.argmin(dist, axis=1)
    q = codebook[idx].reshape(B, H, W, C)
    q = jnp.transpose(q, (0, 3, 1, 2))
    mse = jnp.mean((q - x_nchw) ** 2)
    loss = (1.0 + commitment_cost) * mse
    return q, loss, idx.reshape(B, H, W).astype(jnp.int32)


def _check(x, codebook, commitment_cost, tile_hw):
    quantized, loss, indices = vector_quantize(
        x, codebook, commitment_cost, tile_hw=tile_hw)
    jax.block_until_ready((quantized, loss, indices))
    q_ref, loss_ref, idx_ref = _reference(x, codebook, commitment_cost)
    assert quantized.shape == x.shape
    assert indices.shape == (x.shape[0], x.shape[2], x.shape[3])
    assert jnp.allclose(quantized, q_ref, atol=1e-5)
    assert jnp.allclose(loss, loss_ref, atol=1e-5)
    assert jnp.array_equal(indices, idx_ref)


if __name__ == "__main__":
    commitment_cost = 0.25
    key = jax.random.PRNGKey(0)
    kx, ke, kx2, ke2 = jax.random.split(key, 4)

    # Primary config: B=2, C=8 (embedding_dim), 16x16 spatial, K=128 codewords.
    B, C, H, W = 2, 8, 16, 16
    K = 128
    x = jax.random.normal(kx, (B, C, H, W), dtype=jnp.float32)
    # nn.Embedding weight init: uniform(-1/K, 1/K)
    codebook = jax.random.uniform(ke, (K, C), dtype=jnp.float32,
                                  minval=-1.0 / K, maxval=1.0 / K)
    _check(x, codebook, commitment_cost, tile_hw=1024)  # single tile per image
    _check(x, codebook, commitment_cost, tile_hw=128)   # multi-tile grid

    # Ragged config (HW = 100 not a multiple of 128): exercises padding path.
    B2, C2, H2, W2 = 3, 8, 10, 10
    K2 = 64
    x2 = jax.random.normal(kx2, (B2, C2, H2, W2), dtype=jnp.float32)
    codebook2 = jax.random.uniform(ke2, (K2, C2), dtype=jnp.float32,
                                   minval=-1.0 / K2, maxval=1.0 / K2)
    _check(x2, codebook2, commitment_cost, tile_hw=256)

    print("KERNEL_OK")
</pallas_src>

<mosaic_0001>
module attributes {stable_mosaic.version = 11 : i64} {
  func.func @_vq_kernel(%arg0: i32, %arg1: i32, %arg2: memref<1x8x256xf32, #tpu.memory_space<vmem>>, %arg3: memref<128x8xf32, #tpu.memory_space<vmem>>, %arg4: memref<128x9xf32, #tpu.memory_space<vmem>>, %arg5: memref<1x8x256xf32, #tpu.memory_space<vmem>>, %arg6: memref<1x1x256xi32, #tpu.memory_space<vmem>>, %arg7: memref<1x1x256xf32, #tpu.memory_space<vmem>>, %arg8: memref<9x256xf32, #tpu.memory_space<vmem>>) attributes {dimension_semantics = [#tpu.dimension_semantics<parallel>, #tpu.dimension_semantics<parallel>], iteration_bounds = array<i64: 2, 1>, scalar_prefetch = 0 : i64, scratch_operands = 1 : i64, tpu.core_type = #tpu.core_type<tc>, window_params = [{transform_indices = @transform_0, window_bounds = array<i64: 1, 8, 256>}, {pipeline_mode = #tpu.pipeline_mode<synchronous>, transform_indices = @transform_1, window_bounds = array<i64: 128, 8>}, {pipeline_mode = #tpu.pipeline_mode<synchronous>, transform_indices = @transform_2, window_bounds = array<i64: 128, 9>}, {transform_indices = @transform_3, window_bounds = array<i64: 1, 8, 256>}, {transform_indices = @transform_4, window_bounds = array<i64: 1, 1, 256>}, {transform_indices = @transform_5, window_bounds = array<i64: 1, 1, 256>}]} {
    %c0 = arith.constant 0 : index
    %c0_0 = arith.constant 0 : index
    %c0_1 = arith.constant 0 : index
    %0 = vector.load %arg2[%c0, %c0_0, %c0_1] : memref<1x8x256xf32, #tpu.memory_space<vmem>>, vector<1x8x256xf32>
    %1 = vector.shape_cast %0 : vector<1x8x256xf32> to vector<8x256xf32>
    %c0_2 = arith.constant 0 : index
    %c0_3 = arith.constant 0 : index
    %2 = vector.load %arg8[%c0_2, %c0_3] : memref<9x256xf32, #tpu.memory_space<vmem>>, vector<8x256xf32>
    tpu.vector_store %arg8[%c0_2, %c0_3], %1 {strides = array<i32>} : memref<9x256xf32, #tpu.memory_space<vmem>>, vector<8x256xf32>,
    %cst = arith.constant 1.000000e+00 : f32
    %3 = vector.broadcast %cst : f32 to vector<1x256xf32>
    %c8 = arith.constant 8 : index
    %c0_4 = arith.constant 0 : index
    %4 = vector.load %arg8[%c8, %c0_4] : memref<9x256xf32, #tpu.memory_space<vmem>>, vector<1x256xf32>
    tpu.vector_store %arg8[%c8, %c0_4], %3 {strides = array<i32>} : memref<9x256xf32, #tpu.memory_space<vmem>>, vector<1x256xf32>,
    %c0_5 = arith.constant 0 : index
    %c0_6 = arith.constant 0 : index
    %5 = vector.load %arg8[%c0_5, %c0_6] : memref<9x256xf32, #tpu.memory_space<vmem>>, vector<9x256xf32>
    %c0_7 = arith.constant 0 : index
    %c0_8 = arith.constant 0 : index
    %6 = vector.load %arg4[%c0_7, %c0_8] : memref<128x9xf32, #tpu.memory_space<vmem>>, vector<128x9xf32>
    %cst_9 = arith.constant dense<0.000000e+00> : vector<128x256xf32>
    %7 = tpu.matmul %6, %5, %cst_9 {dimension_numbers = #tpu.dot_dimension_numbers<[1], [0], [0], [1], [0, 0, 1, 1], [], []>} : vector<128x9xf32>, vector<9x256xf32>, vector<128x256xf32> -> vector<128x256xf32>
    %cst_10 = arith.constant dense<0x7F800000> : vector<256xf32>
    %8 = vector.multi_reduction <minimumf>, %7, %cst_10 [0] : vector<128x256xf32> to vector<256xf32>
    %9 = vector.shape_cast %8 : vector<256xf32> to vector<1x256xf32>
    %10 = tpu.iota {dimensions = array<i32: 0>} : vector<128x256xi32>
    %11 = vector.broadcast %9 : vector<1x256xf32> to vector<128x256xf32>
    %12 = arith.cmpf oeq, %7, %11 : vector<128x256xf32>
    %c128_i32 = arith.constant 128 : i32
    %13 = vector.broadcast %c128_i32 : i32 to vector<128x256xi32>
    %14 = arith.select %12, %10, %13 : vector<128x256xi1>, vector<128x256xi32>
    %cst_11 = arith.constant dense<2147483647> : vector<256xi32>
    %15 = vector.multi_reduction <minsi>, %14, %cst_11 [0] : vector<128x256xi32> to vector<256xi32>
    %16 = vector.shape_cast %15 : vector<256xi32> to vector<1x256xi32>
    %c0_12 = arith.constant 0 : index
    %c0_13 = arith.constant 0 : index
    %17 = vector.load %arg3[%c0_12, %c0_13] : memref<128x8xf32, #tpu.memory_space<vmem>>, vector<128x8xf32>
    %18 = vector.broadcast %16 : vector<1x256xi32> to vector<128x256xi32>
    %19 = arith.cmpi eq, %10, %18 : vector<128x256xi32>
    %cst_14 = arith.constant 1.000000e+00 : f32
    %cst_15 = arith.constant 0.000000e+00 : f32
    %20 = vector.broadcast %cst_14 : f32 to vector<128x256xf32>
    %21 = vector.broadcast %cst_15 : f32 to vector<128x256xf32>
    %22 = arith.select %19, %20, %21 : vector<128x256xi1>, vector<128x256xf32>
    %cst_16 = arith.constant dense<0.000000e+00> : vector<8x256xf32>
    %23 = tpu.matmul %17, %22, %cst_16 {dimension_numbers = #tpu.dot_dimension_numbers<[0], [0], [1], [1], [0, 1, 1, 1], [], []>} : vector<128x8xf32>, vector<128x256xf32>, vector<8x256xf32> -> vector<8x256xf32>
    %c0_17 = arith.constant 0 : index
    %c0_18 = arith.constant 0 : index
    %c0_19 = arith.constant 0 : index
    %24 = vector.load %arg5[%c0_17, %c0_18, %c0_19] : memref<1x8x256xf32, #tpu.memory_space<vmem>>, vector<1x8x256xf32>
    %25 = vector.shape_cast %24 : vector<1x8x256xf32> to vector<8x256xf32>
    %26 = vector.shape_cast %23 : vector<8x256xf32> to vector<1x8x256xf32>
    tpu.vector_store %arg5[%c0_17, %c0_18, %c0_19], %26 {strides = array<i32>} : memref<1x8x256xf32, #tpu.memory_space<vmem>>, vector<1x8x256xf32>,
    %c0_20 = arith.constant 0 : index
    %c0_21 = arith.constant 0 : index
    %c0_22 = arith.constant 0 : index
    %27 = vector.load %arg6[%c0_20, %c0_21, %c0_22] : memref<1x1x256xi32, #tpu.memory_space<vmem>>, vector<1x1x256xi32>
    %28 = vector.shape_cast %27 : vector<1x1x256xi32> to vector<1x256xi32>
    %29 = vector.shape_cast %16 : vector<1x256xi32> to vector<1x1x256xi32>
    tpu.vector_store %arg6[%c0_20, %c0_21, %c0_22], %29 {strides = array<i32>} : memref<1x1x256xi32, #tpu.memory_space<vmem>>, vector<1x1x256xi32>,
    %30 = arith.mulf %1, %1 : vector<8x256xf32>
    %cst_23 = arith.constant dense<0.000000e+00> : vector<256xf32>
    %31 = vector.multi_reduction <add>, %30, %cst_23 [0] : vector<8x256xf32> to vector<256xf32>
    %32 = vector.shape_cast %31 : vector<256xf32> to vector<1x256xf32>
    %33 = arith.addf %9, %32 : vector<1x256xf32>
    %c0_24 = arith.constant 0 : index
    %c0_25 = arith.constant 0 : index
    %c0_26 = arith.constant 0 : index
    %34 = vector.load %arg7[%c0_24, %c0_25, %c0_26] : memref<1x1x256xf32, #tpu.memory_space<vmem>>, vector<1x1x256xf32>
    %35 = vector.shape_cast %34 : vector<1x1x256xf32> to vector<1x256xf32>
    %36 = vector.shape_cast %33 : vector<1x256xf32> to vector<1x1x256xf32>
    tpu.vector_store %arg7[%c0_24, %c0_25, %c0_26], %36 {strides = array<i32>} : memref<1x1x256xf32, #tpu.memory_space<vmem>>, vector<1x1x256xf32>,
    return
  }
  func.func @transform_0(%arg0: i32, %arg1: i32) -> (i32, i32, i32) {
    %c0_i32 = arith.constant 0 : i32
    %c0_i32_0 = arith.constant 0 : i32
    return %arg0, %c0_i32, %arg1 : i32, i32, i32
  }
  func.func @transform_1(%arg0: i32, %arg1: i32) -> (i32, i32) {
    %c0_i32 = arith.constant 0 : i32
    %c0_i32_0 = arith.constant 0 : i32
    %c0_i32_1 = arith.constant 0 : i32
    return %c0_i32, %c0_i32_0 : i32, i32
  }
  func.func @transform_2(%arg0: i32, %arg1: i32) -> (i32, i32) {
    %c0_i32 = arith.constant 0 : i32
    %c0_i32_0 = arith.constant 0 : i32
    %c0_i32_1 = arith.constant 0 : i32
    return %c0_i32, %c0_i32_0 : i32, i32
  }
  func.func @transform_3(%arg0: i32, %arg1: i32) -> (i32, i32, i32) {
    %c0_i32 = arith.constant 0 : i32
    %c0_i32_0 = arith.constant 0 : i32
    return %arg0, %c0_i32, %arg1 : i32, i32, i32
  }
  func.func @transform_4(%arg0: i32, %arg1: i32) -> (i32, i32, i32) {
    %c0_i32 = arith.constant 0 : i32
    %c0_i32_0 = arith.constant 0 : i32
    return %arg0, %arg1, %c0_i32 : i32, i32, i32
  }
  func.func @transform_5(%arg0: i32, %arg1: i32) -> (i32, i32, i32) {
    %c0_i32 = arith.constant 0 : i32
    %c0_i32_0 = arith.constant 0 : i32
    return %arg0, %arg1, %c0_i32 : i32, i32, i32
  }
}

</mosaic_0001>

<bundles_post_ra>
// kernel: tpu_custom_call.1
= control target key start
LH: loop header
LB: loop body
LE: loop exit
PB: predicated region body
PF: predicated region fallthrough
CT: control target
= control target key end

     0   :  { %s2291_s0 = inlined_call_operand.vmem [shape: f32[2,8,256], index: 0, kind: input, shape index: {}]   ;;  %s2292_s1 = inlined_call_operand.vmem [shape: f32[128,8], index: 1, kind: input, shape index: {}]   ;;  %s2293_s2 = inlined_call_operand.vmem [shape: f32[128,9], index: 2, kind: input, shape index: {}]   ;;  %s2294_s3 = inlined_call_operand.hbm [shape: f32[2,8,256], index: 3, kind: output, shape index: {0}]   ;;  %s2295_s4 = inlined_call_operand.hbm [shape: s32[2,1,256], index: 4, kind: output, shape index: {1}]   ;;  %s2296_s5 = inlined_call_operand.hbm [shape: f32[2,1,256], index: 5, kind: output, shape index: {2}]  }
   0x1   :  { %2298 = sst [smem:[#allocation10_spill]] %s2291_s0 }
   0x2   :  { %2299 = sst [smem:[#allocation11_spill]] %s2292_s1 }
   0x3   :  { %11 = vsyncpa [#allocation4], 0 }
   0x4   :  { %13 = vsyncpa [#allocation4 + $0x1], 0 }
   0x5   :  { %14 = vsyncpa [#allocation6], 0 }
   0x6   :  { %16 = vsyncpa [#allocation6 + $0x1], 0  ;;  %s1476_s18 = smov 0   ;;  %s1478_s19 = smov 0  }
   0x7   :  { %s1480_s20 = smov 0   ;;  %s1482_s21 = smov 0  }
   0x8   :  { %s1484_s22 = smov 0   ;;  %s1486_s23 = smov 0  }
   0x9 LB: > { %s1163_s24 = sadd.s32 4294967295, %s1438_s23   ;;  %s2297_s25 = sadd.s32 4294967294, %s1438_s23   ;;  %s1438_s23 = sphi %s1486_s23, %s22_s23   ;;  %s1434_s22 = sphi %s1484_s22, %s2327_s22   ;;  %s1430_s21 = sphi %s1482_s21, %s2326_s21   ;;  %s1426_s20 = sphi %s1480_s20, %s2325_s20   ;;  %s1422_s19 = sphi %s1478_s19, %s2324_s19   ;;  %s1418_s18 = sphi %s1476_s18, %s2323_s18  }
   0xa   : > { %s34_s26 = sadd.s32 1, %s1434_s22  ;;  %s113_s27 = sadd.s32 1, %s1426_s20 }
   0xb   : > { %p36_p0 = scmp.ge.s32.totalorder %s34_s26, 2  ;;  %p123_p1 = scmp.ne.s32.totalorder %s1426_s20, %s1422_s19 }
   0xc   : > { %p124_p2 = scmp.eq.s32.totalorder %s1163_s24, 1  ;;  %p129_p3 = scmp.ne.s32.totalorder %s1422_s19, %s1418_s18 }
   0xd   : > { %s2329_s26 = smov (%p36_p0, %s34_s26), 0  ;;  %p130_p5 = scmp.eq.s32.totalorder %s2297_s25, 1 }
   0xe   : > { %p1518_p4 = por %p124_p2, %p123_p1  ;;  %s108_s29 = ssub.s32 %s1434_s22, %s2329_s26 }
   0xf   : > { %p1167_p6 = scmp.ge.s32.totalorder %s1438_s23, 1  ;;  %p111_p7 = scmp.eq.s32.totalorder %s108_s29, 0 }
  0x10   : > { %p1527_p8 = por %p130_p5, %p129_p3  ;;  %p223_p9 = scmp.lt.s32.totalorder %s1438_s23, 3 }
  0x11   : > { %s1533_s6 = scalar_select %p111_p7, %s1426_s20, %s113_s27  }
  0x12   : > { %p224_p10 = pnand %p1167_p6, %p223_p9 }
  0x13   : > { %p266_p11 = scmp.lt.s32.totalorder (!%p224_p10), %s1430_s21, 1  ;;  %s2304_s0 = sld [smem:[#allocation10_spill]] (!%p224_p10) }
  0x14   : > { %227 = sbr.rel (%p224_p10) target bundleno = 601 (0x259), region = 32  ;;  %s2305_s1 = sld [smem:[#allocation11_spill]] (!%p224_p10) }
  0x15   : > { %s2191_s15 = sand.u32 (!%p224_p10), 1, %s1163_s24   ;;  %s1236_s16 = sshll.u32 (!%p224_p10), %s1430_s21, 5 }
  0x16   : > { %s2197_s29 = scalar_lea.hbm (!%p224_p10), %s2295_s4, %s1236_s16  ;;  %s2203_s10 = scalar_lea.hbm (!%p224_p10), %s2296_s5, %s1236_s16 }
  0x17   : > { %s1443_s24 = smov (!%p224_p10), [#allocation5]  }
  0x19   : > { %v280_v0 = vlaneseq  ;;  %v1440_v1 = vmov 0.0   ;;  %s267_s7 = scalar_select %p266_p11, %s1430_s21, 1  ;;  %v1441_v3 = vmov 1.0   ;;  %vm356_vm1 = vcmask 1040384   ;;  %v291_v8 = vld [vmem:[%s2293_s2] sm:$0xff]  ;;  %v292_v9 = vld [vmem:[%s2293_s2 + $0x8] sm:$0xff] }
  0x1a   : > { %427 = vmatprep.mubr.f32.mxu0 %v1440_v1  ;;  %901 = vmatprep.mubr.f32.mxu1 %v1440_v1  ;;  %vm307_vm2 = vcmask 72704   ;;  %v293_v10 = vld [vmem:[%s2293_s2 + $0x10] sm:$0xff]  ;;  %v294_v11 = vld [vmem:[%s2293_s2 + $0x18] sm:$0xff]  ;;  %v295_v12 = vld [vmem:[%s2293_s2 + $0x20] sm:$0xff] }
  0x1b   : > { %vm1539_vm0 = vcmp.lt.s32.totalorder %v280_v0, 256  ;;  %s1234_s8 = sshll.u32 %s267_s7, 4  ;;  %v296_v13 = vld [vmem:[%s2293_s2 + $0x28] sm:$0xff]  ;;  %v297_v14 = vld [vmem:[%s2293_s2 + $0x30] sm:$0xff]  ;;  %v298_v15 = vld [vmem:[%s2293_s2 + $0x38] sm:$0xff] }
  0x1c   : > { %285 = vst.msk [vmem:[#allocation2 + $0x10] ss:$8 sm:$0x3] %vm1539_vm0, %v1441_v3  ;;  %s273_s11 = scalar_lea.vmem %s2304_s0, %s1234_s8  ;;  %v299_v16 = vld [vmem:[%s2293_s2 + $0x40] sm:$0xff]  ;;  %v300_v17 = vld [vmem:[%s2293_s2 + $0x48] sm:$0xff]  ;;  %v301_v18 = vld [vmem:[%s2293_s2 + $0x50] sm:$0xff] }
  0x1d   : > { %v1550_v4 = vld [vmem:[%s273_s11 + $0x8] sm:$0xff]  ;;  %v1552_v5 = vld [vmem:[%s273_s11] sm:$0xff]  ;;  %v302_v19 = vld [vmem:[%s2293_s2 + $0x58] sm:$0xff]  ;;  %s1967_s11 = sand.u32 1, %s1422_s19   ;;  %s1310_s0 = sshll.u32 %s1443_s24, 4  ;;  %s1311_s0 = int_to_ptr.vmem [resolvable:$false] %s1310_s0 }
  0x1e   : > { %v303_v20 = vld [vmem:[%s2293_s2 + $0x60] sm:$0xff]  ;;  %v304_v21 = vld [vmem:[%s2293_s2 + $0x68] sm:$0xff]  ;;  %v305_v22 = vld [vmem:[%s2293_s2 + $0x70] sm:$0xff]  ;;  %s1169_s12 = sshll.u32 %s1967_s11, 1 }
  0x1f   : > { %v306_v23 = vld [vmem:[%s2293_s2 + $0x78] sm:$0xff]  ;;  %v725_v24 = vld [vmem:[%s2305_s1] sm:$0xff]  ;;  %v726_v25 = vld [vmem:[%s2305_s1 + $0x8] sm:$0xff]  ;;  %s2008_s13 = scalar_lea.vmem [#allocation7], %s1169_s12  ;;  %s2107_s14 = scalar_lea.vmem [#allocation5], %s1169_s12 }
  0x20   : > { %805 = vxpose.xlu0.b32.start [1/16] (narrow) %v725_v24, 8  ;;  %v727_v26 = vld [vmem:[%s2305_s1 + $0x10] sm:$0xff]  ;;  %v728_v27 = vld [vmem:[%s2305_s1 + $0x18] sm:$0xff]  ;;  %v729_v28 = vld [vmem:[%s2305_s1 + $0x20] sm:$0xff]  ;;  %v926_v24 = vmul.f32 %v1552_v5, %v1552_v5  ;;  %s1004_s7 = sshll.u32 %s2107_s14, 4  ;;  %s967_s12 = scalar_lea.sflag [#allocation6], %s2191_s15  ;;  %s1005_s7 = int_to_ptr.vmem [resolvable:$true] %s1004_s7 }
  0x21   : > { %v730_v29 = vld [vmem:[%s2305_s1 + $0x28] sm:$0xff]  ;;  %v731_v30 = vld [vmem:[%s2305_s1 + $0x30] sm:$0xff]  ;;  %v732_v31 = vld [vmem:[%s2305_s1 + $0x38] sm:$0xff]  ;;  %s1306_s25 = scalar_lea.vmem %s1005_s7, 32  ;;  %p1313_p1 = scmp.lt.s32.totalorder %s1005_s7, %s1311_s0 }
  0x22   : > { %v733_v32 = vld [vmem:[%s2305_s1 + $0x40] sm:$0xff]  ;;  %v734_v33 = vld [vmem:[%s2305_s1 + $0x48] sm:$0xff]  ;;  %v735_v34 = vld [vmem:[%s2305_s1 + $0x50] sm:$0xff]  ;;  %p1307_p12 = scmp.ne.s32.totalorder %s1005_s7, %s1306_s25 }
  0x23   : > { %v290_v6 = vld [vmem:[#allocation2 + $0x18] sm:$0x1]  ;;  %v289_v7 = vld [vmem:[#allocation2 + $0x10] sm:$0x1]  ;;  %v737_v36 = vld [vmem:[%s2305_s1 + $0x60] sm:$0xff] }
  0x24   : > { %1173 = vmatprep.subr.msk.mxu0 %vm356_vm1, %v290_v6  ;;  %806 = vxpose.xlu0.b32.cont [2/16] (narrow) %v726_v25, 8  ;;  %v736_v35 = vld [vmem:[%s2305_s1 + $0x58] sm:$0xff]  ;;  %v738_v37 = vld [vmem:[%s2305_s1 + $0x68] sm:$0xff]  ;;  %v739_v38 = vld [vmem:[%s2305_s1 + $0x70] sm:$0xff]  ;;  %v927_v25 = vmul.f32 %v1550_v4, %v1550_v4  ;;  %p1308_p13 = pnand %p1307_p12, %p1518_p4 }
  0x25   : > { %1174 = vmatpush1.msk.msra.mxu0 %vm356_vm1, %v289_v7  ;;  %v740_v39 = vld [vmem:[%s2305_s1 + $0x78] sm:$0xff]  ;;  %s1312_s1 = scalar_lea.vmem %s1311_s0, 64 }
  0x26   : > { %393 = vmatprep.subr.mxu0 %v1550_v4  ;;  %v928_v4 = vrot.slane %v926_v24, 4  ;;  %p1309_p0 = pneg %p1308_p13  ;;  %p1314_p2 = scmp.lt.s32.totalorder %s1312_s1, %s1306_s25 }
  0x27   : > { %394 = vmatpush1.msra.mxu0 %v1552_v5 }
  0x28   : > { %1175 = vmatmul.mubr.msk.f32.vlgmr.msra.gmra.mxu0 %vm307_vm2, %v291_v8  ;;  %807 = vxpose.xlu0.b32.cont [3/16] (narrow) %v727_v26, 8  ;;  %p1315_p3 = por %p1314_p2, %p1313_p1 }
  0x29   : > { %433 = vmatprep.mubr.f32.mxu0 %v1440_v1 }
  0x2a   : > { %p1316_p5 = pnand %p1315_p3, %p1309_p0 }
  0x2c   : > { %1176 = vmatmul.mubr.msk.f32.gmra.mxu0 %vm307_vm2, %v292_v9  ;;  %808 = vxpose.xlu0.b32.cont [4/16] (narrow) %v728_v27, 8 }
  0x2d   : > { %439 = vmatprep.mubr.f32.mxu0 %v1440_v1 }
  0x30   : > { %1177 = vmatmul.mubr.msk.f32.gmra.mxu0 %vm307_vm2, %v293_v10  ;;  %809 = vxpose.xlu0.b32.cont [5/16] (narrow) %v729_v28, 8 }
  0x31   : > { %445 = vmatprep.mubr.f32.mxu0 %v1440_v1 }
  0x34   : > { %1178 = vmatmul.mubr.msk.f32.gmra.mxu0 %vm307_vm2, %v294_v11  ;;  %810 = vxpose.xlu0.b32.cont [6/16] (narrow) %v730_v29, 8 }
  0x35   : > { %451 = vmatprep.mubr.f32.mxu0 %v1440_v1 }
  0x38   : > { %1179 = vmatmul.mubr.msk.f32.gmra.mxu0 %vm307_vm2, %v295_v12  ;;  %811 = vxpose.xlu0.b32.cont [7/16] (narrow) %v731_v30, 8 }
  0x39   : > { %457 = vmatprep.mubr.f32.mxu0 %v1440_v1 }
  0x3c   : > { %1180 = vmatmul.mubr.msk.f32.gmra.mxu0 %vm307_vm2, %v296_v13  ;;  %812 = vxpose.xlu0.b32.cont [8/16] (narrow) %v732_v31, 8 }
  0x3d   : > { %463 = vmatprep.mubr.f32.mxu0 %v1440_v1 }
  0x40   : > { %1181 = vmatmul.mubr.msk.f32.gmra.mxu0 %vm307_vm2, %v297_v14  ;;  %813 = vxpose.xlu0.b32.cont [9/16] (narrow) %v733_v32, 8 }
  0x41   : > { %469 = vmatprep.mubr.f32.mxu0 %v1440_v1 }
  0x44   : > { %1182 = vmatmul.mubr.msk.f32.gmra.mxu0 %vm307_vm2, %v298_v15  ;;  %814 = vxpose.xlu0.b32.cont [10/16] (narrow) %v734_v33, 8 }
  0x45   : > { %475 = vmatprep.mubr.f32.mxu0 %v1440_v1 }
  0x48   : > { %1183 = vmatmul.mubr.msk.f32.gmra.mxu0 %vm307_vm2, %v299_v16  ;;  %815 = vxpose.xlu0.b32.cont [11/16] (narrow) %v735_v34, 8 }
  0x49   : > { %481 = vmatprep.mubr.f32.mxu0 %v1440_v1 }
  0x4c   : > { %1184 = vmatmul.mubr.msk.f32.gmra.mxu0 %vm307_vm2, %v300_v17  ;;  %816 = vxpose.xlu0.b32.cont [12/16] (narrow) %v736_v35, 8  ;;  %v934_v35 = vrot.slane %v927_v25, 4 }
  0x4d   : > { %487 = vmatprep.mubr.f32.mxu0 %v1440_v1 }
  0x50   : > { %1185 = vmatmul.mubr.msk.f32.gmra.mxu0 %vm307_vm2, %v301_v18  ;;  %817 = vxpose.xlu0.b32.cont [13/16] (narrow) %v737_v36, 8 }
  0x51   : > { %493 = vmatprep.mubr.f32.mxu0 %v1440_v1 }
  0x54   : > { %1186 = vmatmul.mubr.msk.f32.gmra.mxu0 %vm307_vm2, %v302_v19  ;;  %818 = vxpose.xlu0.b32.cont [14/16] (narrow) %v738_v37, 8 }
  0x55   : > { %499 = vmatprep.mubr.f32.mxu0 %v1440_v1 }
  0x58   : > { %1187 = vmatmul.mubr.msk.f32.gmra.mxu0 %vm307_vm2, %v303_v20  ;;  %819 = vxpose.xlu0.b32.cont [15/16] (narrow) %v739_v38, 8 }
  0x59   : > { %505 = vmatprep.mubr.f32.mxu0 %v1440_v1 }
  0x5c   : > { %1188 = vmatmul.mubr.msk.f32.gmra.mxu0 %vm307_vm2, %v304_v21  ;;  %820 = vxpose.xlu0.b32.end [16/16] (narrow) %v740_v39, 8 }
  0x5d   : > { %511 = vmatprep.mubr.f32.mxu0 %v1440_v1 }
  0x60   : > { %1189 = vmatmul.mubr.msk.f32.gmra.mxu0 %vm307_vm2, %v305_v22 }
  0x61   : > { %517 = vmatprep.mubr.f32.mxu0 %v1440_v1 }
  0x64   : > { %1190 = vmatmul.mubr.msk.f32.gmra.mxu0 %vm307_vm2, %v306_v23 }
  0x9c   : > { %v821_v2 = vpop.trf.xlu0 }
  0xe8   : > { %v1683_v40 = vpop.f32.mrf.mxu0 }
  0xea   : > { %v1685_v41 = vpop.f32.mrf.mxu0 }
  0xec   : > { %v1687_v42 = vpop.f32.mrf.mxu0 }
  0xee   : > { %v1689_v43 = vpop.f32.mrf.mxu0 }
  0xf0   : > { %v1691_v44 = vpop.f32.mrf.mxu0 }
  0xf1   : > { %v524_v6 = vmin.f32 %v1683_v40, %v1691_v44 }
  0xf2   : > { %v1693_v45 = vpop.f32.mrf.mxu0 }
  0xf3   : > { %v545_v9 = vmin.f32 %v1685_v41, %v1693_v45 }
  0xf4   : > { %v1695_v46 = vpop.f32.mrf.mxu0 }
  0xf5   : > { %v525_v7 = vmin.f32 %v1687_v42, %v1695_v46 }
  0xf6   : > { %v1697_v47 = vpop.f32.mrf.mxu0 }
  0xf7   : > { %v546_v10 = vmin.f32 %v1689_v43, %v1697_v47 }
  0xf8   : > { %v1699_v48 = vpop.f32.mrf.mxu0 }
  0xf9   : > { %v526_v11 = vmin.f32 %v524_v6, %v1699_v48 }
  0xfa   : > { %v1701_v49 = vpop.f32.mrf.mxu0 }
  0xfb   : > { %v547_v14 = vmin.f32 %v545_v9, %v1701_v49 }
  0xfc   : > { %v1703_v50 = vpop.f32.mrf.mxu0 }
  0xfd   : > { %v527_v12 = vmin.f32 %v525_v7, %v1703_v50 }
  0xfe   : > { %v1705_v51 = vpop.f32.mrf.mxu0 }
  0xff   : > { %v548_v15 = vmin.f32 %v546_v10, %v1705_v51 }
 0x100   : > { %v1707_v52 = vpop.f32.mrf.mxu0 }
 0x101   : > { %v528_v16 = vmin.f32 %v526_v11, %v1707_v52  ;;  %v929_v11 = vadd.f32 %v928_v4, %v926_v24 }
 0x102   : > { %v1709_v53 = vpop.f32.mrf.mxu0 }
 0x103   : > { %v549_v19 = vmin.f32 %v547_v14, %v1709_v53 }
 0x104   : > { %v1711_v54 = vpop.f32.mrf.mxu0 }
 0x105   : > { %v529_v17 = vmin.f32 %v527_v12, %v1711_v54  ;;  %v935_v12 = vadd.f32 %v934_v35, %v927_v25 }
 0x106   : > { %v1713_v55 = vpop.f32.mrf.mxu0 }
 0x107   : > { %v550_v20 = vmin.f32 %v548_v15, %v1713_v55 }
 0x108   : > { %v1715_v56 = vpop.f32.mrf.mxu0 }
 0x109   : > { %v530_v21 = vmin.f32 %v528_v16, %v1715_v56 }
 0x10a   : > { %v1717_v57 = vpop.f32.mrf.mxu0 }
 0x10b   : > { %v551_v26 = vmin.f32 %v549_v19, %v1717_v57  ;;  %v930_v19 = vrot.slane %v929_v11, 2 }
 0x10c   : > { %v1719_v58 = vpop.f32.mrf.mxu0 }
 0x10d   : > { %v531_v22 = vmin.f32 %v529_v17, %v1719_v58 }
 0x10e   : > { %v1721_v59 = vpop.f32.mrf.mxu0 }
 0x10f   : > { %v552_v27 = vmin.f32 %v550_v20, %v1721_v59  ;;  %v936_v20 = vrot.slane %v935_v12, 2 }
 0x110   : > { %v1723_v60 = vpop.f32.mrf.mxu0 }
 0x111   : > { %v532_v28 = vmin.f32 %v530_v21, %v1723_v60 }
 0x112   : > { %v1725_v61 = vpop.f32.mrf.mxu0 }
 0x113   : > { %v553_v31 = vmin.f32 %v551_v26, %v1725_v61  ;;  %v1784_v26 = vshrl.u32 %v280_v0, 7 }
 0x114   : > { %v1727_v62 = vpop.f32.mrf.mxu0 }
 0x115   : > { %v533_v29 = vmin.f32 %v531_v22, %v1727_v62  ;;  %v1787_v24 = vadd.s32 8, %v1784_v26  ;;  %v1790_v25 = vadd.s32 16, %v1784_v26  ;;  %v1793_v4 = vadd.s32 24, %v1784_v26 }
 0x116   : > { %v1729_v63 = vpop.f32.mrf.mxu0  ;;  %v1798_v0 = vadd.s32 32, %v1784_v26 }
 0x117   : > { %v554_v32 = vmin.f32 %v552_v27, %v1729_v63 }
 0x118   : > { %v1731_v1 = vpop.f32.mrf.mxu0 }
 0x119   : > { %v534_v33 = vmin.f32 %v532_v28, %v1731_v1  ;;  %v931_v28 = vadd.f32 %v930_v19, %v929_v11  ;;  %v1816_v11 = vadd.s32 80, %v1784_v26  ;;  %v1838_v19 = vadd.s32 112, %v1784_v26 }
 0x11a   : > { %v1737_v8 = vpop.f32.mrf.mxu0 }
 0x11b   : > { %v555_v36 = vmin.f32 %v553_v31, %v1737_v8 }
 0x11c   : > { %v1745_v13 = vpop.f32.mrf.mxu0 }
 0x11d   : > { %v535_v5 = vmin.f32 %v533_v29, %v1745_v13  ;;  %v937_v29 = vadd.f32 %v936_v20, %v935_v12  ;;  %v1841_v20 = vadd.s32 120, %v1784_v26 }
 0x11e   : > { %v1751_v18 = vpop.f32.mrf.mxu0 }
 0x11f   : > { %v556_v37 = vmin.f32 %v554_v32, %v1751_v18 }
 0x120   : > { %v1757_v23 = vpop.f32.mrf.mxu0 }
 0x121   : > { %v536_v38 = vmin.f32 %v534_v33, %v1757_v23  ;;  %v1442_v33 = vmov 1966171168  }
 0x122   : > { %v1767_v30 = vpop.f32.mrf.mxu0 }
 0x123   : > { %v557_v7 = vmin.f32 %v555_v36, %v1767_v30  ;;  %v1801_v36 = vadd.s32 40, %v1784_v26 }
 0x124   : > { %v1773_v34 = vpop.f32.mrf.mxu0 }
 0x125   : > { %v537_v39 = vmin.f32 %v535_v5, %v1773_v34  ;;  %v912_v5 = vunpack.c.l.s4 %v1442_v33 }
 0x126   : > { %v1779_v6 = vpop.f32.mrf.mxu0 }
 0x127   : > { %v538_v9 = vmin.f32 %v536_v38, %v537_v39  ;;  %v558_v10 = vmin.f32 %v556_v37, %v1779_v6  ;;  %v1804_v37 = vadd.s32 48, %v1784_v26  ;;  %v1807_v38 = vadd.s32 56, %v1784_v26 }
 0x128   : > { %v1810_v39 = vadd.s32 64, %v1784_v26 }
 0x129   : > { %v539_v14 = vrot.slane %v538_v9, 4  ;;  %v559_v15 = vmin.f32 %v557_v7, %v558_v10  ;;  %v932_v7 = vrot.slane %v931_v28, 1  ;;  %v1813_v10 = vadd.s32 72, %v1784_v26 }
 0x12b   : > { %v540_v16 = vmin.f32 %v538_v9, %v539_v14  ;;  %v560_v17 = vrot.slane %v559_v15, 4  ;;  %v938_v9 = vrot.slane %v937_v29, 1  ;;  %v913_v14 = vunpack.c.0.s8 %v912_v5 }
 0x12d   : > { %v541_v21 = vrot.slane %v540_v16, 2  ;;  %v561_v22 = vmin.f32 %v559_v15, %v560_v17  ;;  %v1819_v15 = vadd.s32 88, %v1784_v26  ;;  %v1825_v17 = vadd.s32 104, %v1784_v26 }
 0x12f   : > { %v542_v27 = vmin.f32 %v540_v16, %v541_v21  ;;  %v562_v32 = vrot.slane %v561_v22, 2  ;;  %v1822_v16 = vadd.s32 96, %v1784_v26  ;;  %v933_v21 = vadd.f32 %v932_v7, %v931_v28 }
 0x131   : > { %v543_v31 = vrot.slane %v542_v27, 1  ;;  %v563_v12 = vmin.f32 %v561_v22, %v562_v32 }
 0x133   : > { %v1795_v35 = vmin.f32 %v542_v27, %v543_v31 }
 0x135   : > { %vm589_vm3 = vcmp.eq.f32.partialorder %v1695_v46, %v1795_v35  ;;  %vm583_vm4 = vcmp.eq.f32.partialorder %v1683_v40, %v1795_v35  ;;  %vm585_vm5 = vcmp.eq.f32.partialorder %v1687_v42, %v1795_v35  ;;  %vm587_vm6 = vcmp.eq.f32.partialorder %v1691_v44, %v1795_v35 }
 0x136   : > { %vm591_vm7 = vcmp.eq.f32.partialorder %v1699_v48, %v1795_v35  ;;  %v1843_v46 = vadd.f32 %v938_v9, %v937_v29  ;;  %vm593_vm8 = vcmp.eq.f32.partialorder %v1703_v50, %v1795_v35  ;;  %v621_v40 = vsel %vm589_vm3, %v1793_v4, 128 }
 0x137   : > { %v564_v42 = vrot.slane %v563_v12, 1  ;;  %v1849_v44 = vsub.s32 %v913_v14, %v1784_v26  ;;  %v615_v48 = vsel %vm583_vm4, %v1784_v26, 128  ;;  %v617_v22 = vsel %vm585_vm5, %v1787_v24, 128 }
 0x138   : > { %v619_v27 = vsel %vm587_vm6, %v1790_v25, 128  ;;  %v623_v31 = vsel %vm591_vm7, %v1798_v0, 128  ;;  %vm595_vm9 = vcmp.eq.f32.partialorder %v1707_v52, %v1795_v35  ;;  %vm597_vm10 = vcmp.eq.f32.partialorder %v1711_v54, %v1795_v35 }
 0x139   : > { %vm599_vm11 = vcmp.eq.f32.partialorder %v1715_v56, %v1795_v35  ;;  %vm601_vm12 = vcmp.eq.f32.partialorder %v1719_v58, %v1795_v35  ;;  %vm603_vm13 = vcmp.eq.f32.partialorder %v1723_v60, %v1795_v35  ;;  %vm605_vm14 = vcmp.eq.f32.partialorder %v1727_v62, %v1795_v35 }
 0x13a   : > { %vm607_vm15 = vcmp.eq.f32.partialorder %v1731_v1, %v1795_v35  ;;  %vm609_vm1 = vcmp.eq.f32.partialorder %v1745_v13, %v1795_v35  ;;  %vm611_vm2 = vcmp.eq.f32.partialorder %v1757_v23, %v1795_v35  ;;  %vm613_vm3 = vcmp.eq.f32.partialorder %v1773_v34, %v1795_v35 }
 0x13b   : > { %vm647_vm4 = vcmp.lt.s32.totalorder %v615_v48, %v619_v27  ;;  %vm649_vm5 = vcmp.lt.s32.totalorder %v617_v22, %v621_v40  ;;  %v625_v52 = vsel %vm593_vm8, %v1801_v36, 128  ;;  %v627_v54 = vsel %vm595_vm9, %v1804_v37, 128 }
 0x13c   : > { %v648_v56 = vsel %vm647_vm4, %v615_v48, %v619_v27  ;;  %v650_v28 = vsel %vm649_vm5, %v617_v22, %v621_v40  ;;  %v629_v29 = vsel %vm597_vm10, %v1807_v38, 128  ;;  %v631_v32 = vsel %vm599_vm11, %v1810_v39, 128 }
 0x13d   : > { %vm651_vm6 = vcmp.lt.s32.totalorder %v648_v56, %v623_v31  ;;  %vm653_vm7 = vcmp.lt.s32.totalorder %v650_v28, %v625_v52  ;;  %v633_v33 = vsel %vm601_vm12, %v1813_v10, 128  ;;  %v1886_v9 = vmin.f32 %v563_v12, %v564_v42 }
 0x13e   : > { %v652_v5 = vsel %vm651_vm6, %v648_v56, %v623_v31  ;;  %v654_v7 = vsel %vm653_vm7, %v650_v28, %v625_v52  ;;  %v635_v50 = vsel %vm603_vm13, %v1816_v11, 128  ;;  %v637_v14 = vsel %vm605_vm14, %v1819_v15, 128 }
 0x13f   : > { %vm655_vm8 = vcmp.lt.s32.totalorder %v652_v5, %v627_v54  ;;  %vm657_vm9 = vcmp.lt.s32.totalorder %v654_v7, %v629_v29  ;;  %v639_v58 = vsel %vm607_vm15, %v1822_v16, 128  ;;  %v641_v12 = vsel %vm609_vm1, %v1825_v17, 128 }
 0x140   : > { %v656_v40 = vsel %vm655_vm8, %v652_v5, %v627_v54  ;;  %v658_v60 = vsel %vm657_vm9, %v654_v7, %v629_v29  ;;  %v643_v62 = vsel %vm611_vm2, %v1838_v19, 128  ;;  %v645_v42 = vsel %vm613_vm3, %v1841_v20, 128 }
 0x141   : > { %vm659_vm10 = vcmp.lt.s32.totalorder %v656_v40, %v631_v32  ;;  %vm661_vm11 = vcmp.lt.s32.totalorder %v658_v60, %v633_v33  ;;  %vm584_vm12 = vcmp.eq.f32.partialorder %v1685_v41, %v1886_v9  ;;  %v940_v13 = vadd.f32 %v933_v21, %v1795_v35 }
 0x142   : > { %v660_v1 = vsel %vm659_vm10, %v656_v40, %v631_v32  ;;  %v662_v48 = vsel %vm661_vm11, %v658_v60, %v633_v33  ;;  %vm586_vm15 = vcmp.eq.f32.partialorder %v1689_v43, %v1886_v9  ;;  %vm590_vm1 = vcmp.eq.f32.partialorder %v1697_v47, %v1886_v9 }
 0x143   : > { %vm663_vm13 = vcmp.lt.s32.totalorder %v660_v1, %v635_v50  ;;  %vm665_vm14 = vcmp.lt.s32.totalorder %v662_v48, %v637_v14  ;;  %vm588_vm2 = vcmp.eq.f32.partialorder %v1693_v45, %v1886_v9  ;;  %vm592_vm3 = vcmp.eq.f32.partialorder %v1701_v49, %v1886_v9 }
 0x144   : > { %v664_v23 = vsel %vm663_vm13, %v660_v1, %v635_v50  ;;  %v666_v34 = vsel %vm665_vm14, %v662_v48, %v637_v14  ;;  %vm594_vm6 = vcmp.eq.f32.partialorder %v1705_v51, %v1886_v9  ;;  %vm596_vm7 = vcmp.eq.f32.partialorder %v1709_v53, %v1886_v9 }
 0x145   : > { %vm667_vm4 = vcmp.lt.s32.totalorder %v664_v23, %v639_v58  ;;  %vm669_vm5 = vcmp.lt.s32.totalorder %v666_v34, %v641_v12  ;;  %vm598_vm8 = vcmp.eq.f32.partialorder %v1713_v55, %v1886_v9  ;;  %v622_v47 = vsel %vm590_vm1, %v1793_v4, 128 }
 0x146   : > { %v668_v35 = vsel %vm667_vm4, %v664_v23, %v639_v58  ;;  %v670_v21 = vsel %vm669_vm5, %v666_v34, %v641_v12  ;;  %vm600_vm11 = vcmp.eq.f32.partialorder %v1717_v57, %v1886_v9  ;;  %vm602_vm13 = vcmp.eq.f32.partialorder %v1721_v59, %v1886_v9 }
 0x147   : > { %vm671_vm9 = vcmp.lt.s32.totalorder %v668_v35, %v643_v62  ;;  %vm673_vm10 = vcmp.lt.s32.totalorder %v670_v21, %v645_v42  ;;  %v616_v31 = vsel %vm584_vm12, %v1784_v26, 128  ;;  %v620_v52 = vsel %vm588_vm2, %v1790_v25, 128 }
 0x148   : > { %v672_v22 = vsel %vm671_vm9, %v668_v35, %v643_v62  ;;  %v674_v27 = vsel %vm673_vm10, %v670_v21, %v645_v42  ;;  %vm604_vm1 = vcmp.eq.f32.partialorder %v1725_v61, %v1886_v9  ;;  %vm606_vm4 = vcmp.eq.f32.partialorder %v1729_v63, %v1886_v9 }
 0x149   : > { %vm675_vm14 = vcmp.lt.s32.totalorder %v672_v22, %v674_v27  ;;  %v618_v54 = vsel %vm586_vm15, %v1787_v24, 128  ;;  %vm608_vm12 = vcmp.eq.f32.partialorder %v1737_v8, %v1886_v9  ;;  %vm610_vm5 = vcmp.eq.f32.partialorder %v1751_v18, %v1886_v9 }
 0x14a   : > { %v676_v41 = vsel %vm675_vm14, %v672_v22, %v674_v27  ;;  %vm612_vm2 = vcmp.eq.f32.partialorder %v1767_v30, %v1886_v9  ;;  %vm614_vm9 = vcmp.eq.f32.partialorder %v1779_v6, %v1886_v9  ;;  %v624_v43 = vsel %vm592_vm3, %v1798_v0, 128 }
 0x14b   : > { %v677_v45 = vrot.slane %v676_v41, 4  ;;  %v626_v56 = vsel %vm594_vm6, %v1801_v36, 128  ;;  %vm686_vm15 = vcmp.lt.s32.totalorder %v616_v31, %v620_v52  ;;  %v628_v28 = vsel %vm596_vm7, %v1804_v37, 128 }
 0x14c   : > { %v687_v29 = vsel %vm686_vm15, %v616_v31, %v620_v52  ;;  %vm688_vm10 = vcmp.lt.s32.totalorder %v618_v54, %v622_v47  ;;  %v941_v49 = vadd.f32 %v1843_v46, %v1886_v9  ;;  %v630_v51 = vsel %vm598_vm8, %v1807_v38, 128 }
 0x14d   : > { %vm678_vm3 = vcmp.lt.s32.totalorder %v676_v41, %v677_v45  ;;  %v689_v32 = vsel %vm688_vm10, %v618_v54, %v622_v47  ;;  %vm690_vm6 = vcmp.lt.s32.totalorder %v687_v29, %v624_v43  ;;  %v632_v50 = vsel %vm600_vm11, %v1810_v39, 128 }
 0x14e   : > { %v679_v33 = vsel %vm678_vm3, %v676_v41, %v677_v45  ;;  %v691_v5 = vsel %vm690_vm6, %v687_v29, %v624_v43  ;;  %vm692_vm14 = vcmp.lt.s32.totalorder %v689_v32, %v626_v56  ;;  %v944_v53 = vcombine.low %v940_v13, %v941_v49 }
 0x14f   : > { %v680_v7 = vrot.slane %v679_v33, 2  ;;  %v693_v46 = vsel %vm692_vm14, %v689_v32, %v626_v56  ;;  %vm694_vm7 = vcmp.lt.s32.totalorder %v691_v5, %v628_v28  ;;  %v634_v55 = vsel %vm602_vm13, %v1813_v10, 128 }
 0x150   : > { %v695_v14 = vsel %vm694_vm7, %v691_v5, %v628_v28  ;;  %vm696_vm8 = vcmp.lt.s32.totalorder %v693_v46, %v630_v51  ;;  %v951_v58 = vrot.slane %v944_v53, %v1849_v44  ;;  %v636_v12 = vsel %vm604_vm1, %v1816_v11, 128 }
 0x151   : > { %vm681_vm15 = vcmp.lt.s32.totalorder %v679_v33, %v680_v7  ;;  %v697_v57 = vsel %vm696_vm8, %v693_v46, %v630_v51  ;;  %vm698_vm11 = vcmp.lt.s32.totalorder %v695_v14, %v632_v50  ;;  %v638_v42 = vsel %vm606_vm4, %v1819_v15, 128 }
 0x152   : > { %v682_v40 = vsel %vm681_vm15, %v679_v33, %v680_v7  ;;  %v699_v60 = vsel %vm698_vm11, %v695_v14, %v632_v50  ;;  %vm700_vm10 = vcmp.lt.s32.totalorder %v697_v57, %v634_v55  ;;  %v958_v62 = vrot.slane %v951_v58, %v1849_v44 }
 0x153   : > { %v683_v59 = vrot.slane %v682_v40, 1  ;;  %v701_v1 = vsel %vm700_vm10, %v697_v57, %v634_v55  ;;  %vm702_vm13 = vcmp.lt.s32.totalorder %v699_v60, %v636_v12  ;;  %v640_v61 = vsel %vm608_vm12, %v1822_v16, 128 }
 0x154   : > { %v642_v48 = vsel %vm610_vm5, %v1825_v17, 128  ;;  %v703_v13 = vsel %vm702_vm13, %v699_v60, %v636_v12  ;;  %vm704_vm1 = vcmp.lt.s32.totalorder %v701_v1, %v638_v42  ;;  %960 = vst.msk [vmem:[%s2008_s13] sm:$0x3] %vm1539_vm0, %v958_v62  ;;  %v644_v63 = vsel %vm612_vm2, %v1838_v19, 128 }
 0x155   : > { %vm684_vm4 = vcmp.lt.s32.totalorder %v682_v40, %v683_v59  ;;  %v705_v8 = vsel %vm704_vm1, %v701_v1, %v638_v42  ;;  %vm706_vm12 = vcmp.lt.s32.totalorder %v703_v13, %v640_v61  ;;  %v646_v18 = vsel %vm614_vm9, %v1841_v20, 128 }
 0x156   : > { %v2017_v23 = vsel %vm684_vm4, %v682_v40, %v683_v59  ;;  %v707_v34 = vsel %vm706_vm12, %v703_v13, %v640_v61  ;;  %vm708_vm5 = vcmp.lt.s32.totalorder %v705_v8, %v642_v48 }
 0x157   : > { %v709_v35 = vsel %vm708_vm5, %v705_v8, %v642_v48  ;;  %vm710_vm3 = vcmp.lt.s32.totalorder %v707_v34, %v644_v63  ;;  %vm771_vm6 = vcmp.eq.s32.totalorder %v1841_v20, %v2017_v23  ;;  %vm769_vm14 = vcmp.eq.s32.totalorder %v1838_v19, %v2017_v23 }
 0x158   : > { %v711_v30 = vsel %vm710_vm3, %v707_v34, %v644_v63  ;;  %vm712_vm2 = vcmp.lt.s32.totalorder %v709_v35, %v646_v18  ;;  %vm767_vm7 = vcmp.eq.s32.totalorder %v1825_v17, %v2017_v23  ;;  %vm765_vm8 = vcmp.eq.s32.totalorder %v1822_v16, %v2017_v23 }
 0x159   : > { %v713_v6 = vsel %vm712_vm2, %v709_v35, %v646_v18 }
 0x15a   : > { %vm714_vm10 = vcmp.lt.s32.totalorder %v711_v30, %v713_v6 }
 0x15b   : > { %v715_v9 = vsel %vm714_vm10, %v711_v30, %v713_v6 }
 0x15c   : > { %v716_v21 = vrot.slane %v715_v9, 4 }
 0x15e   : > { %vm717_vm10 = vcmp.lt.s32.totalorder %v715_v9, %v716_v21 }
 0x15f   : > { %v718_v47 = vsel %vm717_vm10, %v715_v9, %v716_v21 }
 0x160   : > { %v719_v22 = vrot.slane %v718_v47, 2 }
 0x162   : > { %vm720_vm12 = vcmp.lt.s32.totalorder %v718_v47, %v719_v22 }
 0x163   : > { %v721_v27 = vsel %vm720_vm12, %v718_v47, %v719_v22 }
 0x164   : > { %v722_v31 = vrot.slane %v721_v27, 1 }
 0x166   : > { %vm723_vm5 = vcmp.lt.s32.totalorder %v721_v27, %v722_v31 }
 0x167   : > { %v724_v52 = vsel %vm723_vm5, %v721_v27, %v722_v31 }
 0x168   : > { %vm772_vm3 = vcmp.eq.s32.totalorder %v1841_v20, %v724_v52  ;;  %vm770_vm13 = vcmp.eq.s32.totalorder %v1838_v19, %v724_v52  ;;  %vm768_vm2 = vcmp.eq.s32.totalorder %v1825_v17, %v724_v52  ;;  %vm766_vm11 = vcmp.eq.s32.totalorder %v1822_v16, %v724_v52 }
 0x169   : > { %1191 = vmatprep.subr.msk.mxu1 %vm772_vm3, %v1441_v3  ;;  %vm756_vm5 = vcmp.eq.s32.totalorder %v1807_v38, %v724_v52  ;;  %vm754_vm15 = vcmp.eq.s32.totalorder %v1804_v37, %v724_v52  ;;  %vm752_vm9 = vcmp.eq.s32.totalorder %v1801_v36, %v724_v52  ;;  %vm750_vm3 = vcmp.eq.s32.totalorder %v1798_v0, %v724_v52 }
 0x16a   : > { %1192 = vmatpush1.msk.msra.mxu1 %vm771_vm6, %v1441_v3  ;;  %vm748_vm1 = vcmp.eq.s32.totalorder %v1793_v4, %v724_v52  ;;  %vm746_vm12 = vcmp.eq.s32.totalorder %v1790_v25, %v724_v52  ;;  %vm744_vm10 = vcmp.eq.s32.totalorder %v1787_v24, %v724_v52  ;;  %vm742_vm4 = vcmp.eq.s32.totalorder %v1784_v26, %v724_v52 }
 0x16b   : > { %1193 = vmatprep.subr.msk.mxu1 %vm770_vm13, %v1441_v3  ;;  %v910_v20 = vcombine.low %v2017_v23, %v724_v52  ;;  %vm2306_vm6 = vcmp.eq.s32.totalorder %v1819_v15, %v724_v52  ;;  %vm2311_vm13 = vcmp.eq.s32.totalorder %v1813_v10, %v2017_v23 }
 0x16c   : > { %1194 = vmatpush1.msk.msra.mxu1 %vm769_vm14, %v1441_v3  ;;  %vm2307_vm14 = vcmp.eq.s32.totalorder %v1819_v15, %v2017_v23 }
 0x16d   : > { %1195 = vmatprep.subr.msk.mxu1 %vm768_vm2, %v1441_v3  ;;  %v917_v54 = vrot.slane %v910_v20, %v1849_v44  ;;  %vm2313_vm2 = vcmp.eq.s32.totalorder %v1810_v39, %v2017_v23 }
 0x16e   : > { %1196 = vmatpush1.msk.msra.mxu1 %vm767_vm7, %v1441_v3  ;;  %vm2308_vm7 = vcmp.eq.s32.totalorder %v1816_v11, %v724_v52 }
 0x16f   : > { %1197 = vmatprep.subr.msk.mxu1 %vm766_vm11, %v1441_v3  ;;  %v924_v19 = vrot.slane %v917_v54, %v1849_v44  ;;  %vm2310_vm11 = vcmp.eq.s32.totalorder %v1813_v10, %v724_v52 }
 0x170   : > { %1198 = vmatpush1.msk.msra.mxu1 %vm765_vm8, %v1441_v3  ;;  %vm2309_vm8 = vcmp.eq.s32.totalorder %v1816_v11, %v2017_v23 }
 0x171   : > { %1199 = vmatprep.subr.msk.mxu1 %vm2306_vm6, %v1441_v3  ;;  %925 = vst.msk [vmem:[%s2107_s14] sm:$0x3] %vm1539_vm0, %v924_v19  ;;  %vm2312_vm0 = vcmp.eq.s32.totalorder %v1810_v39, %v724_v52  ;;  %vm2314_vm6 = vcmp.eq.s32.totalorder %v1807_v38, %v2017_v23 }
 0x172   : > { %1200 = vmatpush1.msk.msra.mxu1 %vm2307_vm14, %v1441_v3  ;;  %vm2315_vm14 = vcmp.eq.s32.totalorder %v1804_v37, %v2017_v23 }
 0x173   : > { %1201 = vmatprep.subr.msk.mxu1 %vm2308_vm7, %v1441_v3 }
 0x174   : > { %1202 = vmatpush1.msk.msra.mxu1 %vm2309_vm8, %v1441_v3 }
 0x175   : > { %1203 = vmatprep.subr.msk.mxu1 %vm2310_vm11, %v1441_v3 }
 0x176   : > { %1204 = vmatpush1.msk.msra.mxu1 %vm2311_vm13, %v1441_v3 }
 0x177   : > { %1205 = vmatprep.subr.msk.mxu1 %vm2312_vm0, %v1441_v3 }
 0x178   : > { %1206 = vmatpush1.msk.msra.mxu1 %vm2313_vm2, %v1441_v3 }
 0x179   : > { %1207 = vmatprep.subr.msk.mxu1 %vm756_vm5, %v1441_v3  ;;  %vm2316_vm5 = vcmp.eq.s32.totalorder %v1801_v36, %v2017_v23 }
 0x17a   : > { %1208 = vmatpush1.msk.msra.mxu1 %vm2314_vm6, %v1441_v3 }
 0x17b   : > { %1209 = vmatprep.subr.msk.mxu1 %vm754_vm15, %v1441_v3  ;;  %vm2317_vm15 = vcmp.eq.s32.totalorder %v1798_v0, %v2017_v23 }
 0x17c   : > { %1210 = vmatpush1.msk.msra.mxu1 %vm2315_vm14, %v1441_v3 }
 0x17d   : > { %1211 = vmatprep.subr.msk.mxu1 %vm752_vm9, %v1441_v3  ;;  %vm2318_vm9 = vcmp.eq.s32.totalorder %v1793_v4, %v2017_v23 }
 0x17e   : > { %1212 = vmatpush1.msk.msra.mxu1 %vm2316_vm5, %v1441_v3 }
 0x17f   : > { %1213 = vmatprep.subr.msk.mxu1 %vm750_vm3, %v1441_v3  ;;  %vm2319_vm3 = vcmp.eq.s32.totalorder %v1790_v25, %v2017_v23 }
 0x180   : > { %1214 = vmatpush1.msk.msra.mxu1 %vm2317_vm15, %v1441_v3 }
 0x181   : > { %1215 = vmatprep.subr.msk.mxu1 %vm748_vm1, %v1441_v3  ;;  %vm2320_vm1 = vcmp.eq.s32.totalorder %v1787_v24, %v2017_v23 }
 0x182   : > { %1216 = vmatpush1.msk.msra.mxu1 %vm2318_vm9, %v1441_v3 }
 0x183   : > { %1217 = vmatprep.subr.msk.mxu1 %vm746_vm12, %v1441_v3  ;;  %vm2321_vm12 = vcmp.eq.s32.totalorder %v1784_v26, %v2017_v23 }
 0x184   : > { %1218 = vmatpush1.msk.msra.mxu1 %vm2319_vm3, %v1441_v3 }
 0x185   : > { %1219 = vmatprep.subr.msk.mxu1 %vm744_vm10, %v1441_v3 }
 0x186   : > { %1220 = vmatpush1.msk.msra.mxu1 %vm2320_vm1, %v1441_v3 }
 0x187   : > { %1221 = vmatprep.subr.msk.mxu1 %vm742_vm4, %v1441_v3 }
 0x188   : > { %1222 = vmatpush1.msk.msra.mxu1 %vm2321_vm12, %v1441_v3 }
 0x189   : > { %902 = vmatmul.mubr.f32.vlgmr.msra.gmra.mxu1 %v821_v2 }
 0x18a   : > { %1319 = shalt.err (!%p1316_p5)
}
 0x18b   : > { %s1320_s14 = scalar_lea.hbm %s2197_s29, 32  ;;  %s1324_s27 = scalar_lea.hbm %s2295_s4, 64 }
 0x18c   : > { %p1321_p6 = scmp.ne.s32.totalorder %s2197_s29, %s1320_s14  ;;  %p1325_p10 = scmp.lt.s32.totalorder %s2197_s29, %s2295_s4 }
 0x18d   : > { %p1326_p11 = scmp.lt.s32.totalorder %s1324_s27, %s1320_s14 }
 0x18e   : > { %p1322_p7 = pnand %p1321_p6, %p1518_p4 }
 0x18f   : > { %p1327_p12 = por %p1326_p11, %p1325_p10 }
 0x190   : > { %p1323_p9 = pneg %p1322_p7 }
 0x192   : > { %p1328_p13 = pnand %p1327_p12, %p1323_p9 }
 0x194   : > { %1331 = shalt.err (!%p1328_p13)
}
 0x195   : > { %1239 = dma.vmem_to_hbm [thread:$0]  (%p1518_p4), %s1005_s7, 32, %s2197_s29, %s967_s12  }
 0x196   : > { %s1020_s0 = sshll.u32 %s2008_s13, 4  ;;  %s1444_s25 = smov [#allocation7]   ;;  %s1021_s0 = int_to_ptr.vmem [resolvable:$true] %s1020_s0 }
 0x197   : > { %s1332_s1 = scalar_lea.vmem %s1021_s0, 32  ;;  %s1336_s24 = sshll.u32 %s1444_s25, 4  ;;  %s1337_s24 = int_to_ptr.vmem [resolvable:$false] %s1336_s24 }
 0x198   : > { %p1333_p0 = scmp.ne.s32.totalorder %s1021_s0, %s1332_s1  ;;  %s1338_s14 = scalar_lea.vmem %s1337_s24, 64 }
 0x199   : > { %p1339_p3 = scmp.lt.s32.totalorder %s1021_s0, %s1337_s24  ;;  %p1340_p5 = scmp.lt.s32.totalorder %s1338_s14, %s1332_s1 }
 0x19a   : > { %p1334_p1 = pnand %p1333_p0, %p1518_p4 }
 0x19b   : > { %p1341_p6 = por %p1340_p5, %p1339_p3 }
 0x19c   : > { %p1335_p2 = pneg %p1334_p1 }
 0x19e   : > { %p1342_p7 = pnand %p1341_p6, %p1335_p2 }
 0x1a0   : > { %1345 = shalt.err (!%p1342_p7)
}
 0x1a1   : > { %s1346_s13 = scalar_lea.hbm %s2203_s10, 32  ;;  %s1350_s16 = scalar_lea.hbm %s2296_s5, 64 }
 0x1a2   : > { %p1347_p9 = scmp.ne.s32.totalorder %s2203_s10, %s1346_s13  ;;  %p1351_p12 = scmp.lt.s32.totalorder %s2203_s10, %s2296_s5 }
 0x1a3   : > { %p1352_p13 = scmp.lt.s32.totalorder %s1350_s16, %s1346_s13 }
 0x1a4   : > { %p1348_p10 = pnand %p1347_p9, %p1518_p4 }
 0x1a5   : > { %p1353_p0 = por %p1352_p13, %p1351_p12 }
 0x1a6   : > { %p1349_p11 = pneg %p1348_p10 }
 0x1a8   : > { %p1354_p1 = pnand %p1353_p0, %p1349_p11 }
 0x1aa   : > { %1357 = shalt.err (!%p1354_p1)
}
 0x1ab   : > { %1240 = dma.vmem_to_hbm [thread:$0]  (%p1518_p4), %s1021_s0, 32, %s2203_s10, %s967_s12  }
 0x1ac   : > { %s1168_s8 = sshll.u32 %s1967_s11, 4  ;;  %s1235_s25 = sshll.u32 %s1430_s21, 8 }
 0x1ad   : > { %s250_s9 = scalar_lea.vmem [#allocation3], %s1168_s8  ;;  %s986_s15 = scalar_lea.hbm %s2294_s3, %s1235_s25 }
 0x1ae   : > { %s988_s1 = sshll.u32 %s250_s9, 4  ;;  %s962_s13 = scalar_lea.sflag [#allocation4], %s1967_s11  ;;  %s2245_s1 = int_to_ptr.vmem [resolvable:$true] %s988_s1 }
 0x1af   : > { %s1358_s29 = scalar_lea.vmem %s2245_s1, 256  ;;  %s1445_s21 = smov [#allocation3]  }
 0x1b0   : > { %p1359_p2 = scmp.ne.s32.totalorder %s2245_s1, %s1358_s29  ;;  %s1362_s10 = sshll.u32 %s1445_s21, 4  ;;  %s1363_s10 = int_to_ptr.vmem [resolvable:$false] %s1362_s10 }
 0x1b1   : > { %s1364_s12 = scalar_lea.vmem %s1363_s10, 512  ;;  %p1365_p6 = scmp.lt.s32.totalorder %s2245_s1, %s1363_s10 }
 0x1b2   : > { %p1360_p3 = pnand %p1359_p2, %p1518_p4  ;;  %p1366_p7 = scmp.lt.s32.totalorder %s1364_s12, %s1358_s29 }
 0x1b4   : > { %p1361_p5 = pneg %p1360_p3  ;;  %p1367_p9 = por %p1366_p7, %p1365_p6 }
 0x1b6   : > { %p1368_p10 = pnand %p1367_p9, %p1361_p5 }
 0x249   : > { %v903_v3 = vpop.f32.mrf.mxu1 }
 0x24a   : > { %908 = vst [vmem:[%s250_s9] sm:$0xff] %v903_v3 }
 0x24b   : > { %v905_v26 = vpop.f32.mrf.mxu1 }
 0x24c   : > { %909 = vst [vmem:[%s250_s9 + $0x8] sm:$0xff] %v905_v26 }
 0x24d   : > { %1371 = shalt.err (!%p1368_p10)
}
 0x24e   : > { %s1372_s0 = scalar_lea.hbm %s986_s15, 256  ;;  %s1376_s16 = scalar_lea.hbm %s2294_s3, 512 }
 0x24f   : > { %p1373_p11 = scmp.ne.s32.totalorder %s986_s15, %s1372_s0  ;;  %p1377_p0 = scmp.lt.s32.totalorder %s986_s15, %s2294_s3 }
 0x250   : > { %p1378_p1 = scmp.lt.s32.totalorder %s1376_s16, %s1372_s0 }
 0x251   : > { %p1374_p12 = pnand %p1373_p11, %p1518_p4 }
 0x252   : > { %p1379_p2 = por %p1378_p1, %p1377_p0 }
 0x253   : > { %p1375_p13 = pneg %p1374_p12 }
 0x255   : > { %p1380_p3 = pnand %p1379_p2, %p1375_p13 }
 0x257   : > { %1383 = shalt.err (!%p1380_p3)
}
 0x258   : > { %1238 = dma.vmem_to_hbm [thread:$0]  (%p1518_p4), %s2245_s1, 256, %s986_s15, %s962_s13  }
 0x259 PF: > { %p1254_p5 = scmp.ge.s32.totalorder %s1438_s23, 2  ;;  %s1032_s8 = sand.u32 1, %s1418_s18  }
 0x25a   : > { %s1033_s9 = scalar_lea.sflag [#allocation4], %s1032_s8 }
 0x25b   : > { %p1245_p6 = pnand %p1254_p5, %p1527_p8 }
 0x25d   : > { %p1246_p7 = pneg %p1245_p6 }
 0x25f   : > { %1409 = dma.done.wait (%p1246_p7), %s1033_s9, 256  }
 0x260   : > { %1411 = vsyncadd (%p1246_p7), %s1033_s9, 4294967040  ;;  %s2322_s25 = sadd.s32 4294967294, %s1438_s23  }
 0x261   : > { %s1041_s24 = sand.u32 1, %s2322_s25  }
 0x262   : > { %s1042_s14 = scalar_lea.sflag [#allocation6], %s1041_s24 }
 0x263   : > { %1413 = dma.done.wait (%p1246_p7), %s1042_s14, 64  }
 0x264   : > { %1415 = vsyncadd (%p1246_p7), %s1042_s14, 4294967232  ;;  %s22_s23 = sadd.s32 1, %s1438_s23   ;;  %s2323_s18 = smov %s1422_s19 }
 0x265   : > { %p19_p4 = scmp.ge.s32.totalorder %s22_s23, 4   ;;  %s2324_s19 = smov %s1426_s20 }
 0x266   : > { %s2325_s20 = smov %s1533_s6  ;;  %s2326_s21 = smov %s1434_s22 }
 0x267   : > { %s2327_s22 = smov %s2329_s26  ;;  %21 = sbr.rel (!%p19_p4) target bundleno = 9 (0x9), region = 100 }
 0x26c   :  { %1056 = vsyncpa [#allocation4], 1 }
 0x26d   :  { %1058 = vsyncpa [#allocation4 + $0x1], 1 }
 0x26e   :  { %1059 = vsyncpa [#allocation6], 1 }
 0x26f   :  { %1061 = vsyncpa [#allocation6 + $0x1], 1 }

</bundles_post_ra>
